<compile_context>
chip_gen: v5e
topology: v5e:2x2
jax: 0.10.0
libtpu: 0.0.40
codegen_flags: <defaults>
</compile_context>

<pallas_src>
import functools

import jax
import jax.numpy as jnp
from jax.experimental import pallas as pl
from jax.experimental.pallas import tpu as pltpu

EPS = 1e-5
LANE = 128
_PAD_NEG = -1e30          # bn+relu maps this padding to exactly 0.0


# ------------------------------- helpers ------------------------------------ #

def _round_up(x, m):
    return (x + m - 1) // m * m


def _vmem_budget_bytes():
    """Generation-aware VMEM budget (~75% of physical capacity)."""
    try:
        cap = int(pltpu.get_tpu_info().vmem_capacity_bytes)
    except Exception:
        cap = 64 * 1024 * 1024
    return (cap * 3) // 4


def _compiler_params(semantics, vmem_limit):
    return pltpu.CompilerParams(dimension_semantics=semantics,
                                vmem_limit_bytes=int(vmem_limit))


def _pick_row_tile(ho, wo, cpad, store_itemsize, budget):
    """Largest divisor of Ho whose (rows x Wo) tile keeps the per-tile working
    set comfortably inside the VMEM budget (capped at 4096 rows)."""
    max_rows = budget // (8 * cpad * max(store_itemsize, 2))
    max_rows = max(wo, min(max_rows, 4096))
    tr = 1
    for cand in range(1, ho + 1):
        if ho % cand == 0 and cand * wo <= max_rows:
            tr = cand
    return tr


def _im2col_3x3(x_pad, h_out, w_out, stride):
    """(B, Hp, Wp, C) zero-padded NHWC -> (B*h_out*w_out, 9*C) patches.
    Column layout (di*3 + dj)*C + c, matching HWIO weights reshaped to (9*C, Cout).
    Only used for the stride-2 conv1 of the downsample path."""
    c = x_pad.shape[-1]
    cols = []
    for di in range(3):
        for dj in range(3):
            sl = x_pad[:, di:di + stride * (h_out - 1) + 1:stride,
                       dj:dj + stride * (w_out - 1) + 1:stride, :]
            cols.append(sl.reshape(-1, c))
    return jnp.concatenate(cols, axis=-1)


def _finalize_stats(s_partial, q_partial, n):
    """Reduce per-tile partial sums -> (mean, rsqrt(var + eps)), var clamped >= 0."""
    s = jnp.sum(s_partial, axis=0)          # (1, cpad)
    q = jnp.sum(q_partial, axis=0)
    m = s / n
    v = jnp.maximum(q / n - m * m, 0.0)
    return m, jax.lax.rsqrt(v + EPS)


# ----------------------------- Pallas kernels -------------------------------- #

def _accum_taps(tap, w_ref, tr, wo):
    """Sum over 9 taps of (tr*wo, Ck) @ (Ck, Cpad) MXU dots, f32 accumulation."""
    acc = None
    for ti in range(9):
        di, dj = divmod(ti, 3)
        a = tap(di, dj).reshape(tr * wo, -1)
        d = jnp.dot(a, w_ref[ti], preferred_element_type=jnp.float32)
        acc = d if acc is None else acc + d
    return acc


def _write_conv_outputs(acc, y_ref, s_ref, q_ref):
    y_ref[...] = acc.astype(y_ref.dtype)
    s_ref[...] = jnp.sum(acc, axis=0, keepdims=True)
    q_ref[...] = jnp.sum(acc * acc, axis=0, keepdims=True)


def _band_conv_plain_kernel(img_ref, w_ref, y_ref, s_ref, q_ref, *, tr, wo,
                            matmul_dtype):
    """3x3 stride-1 conv: taps sliced in-kernel from the resident padded image."""
    r = pl.program_id(1)

    def tap(di, dj):
        return img_ref[pl.ds(r * tr + di, tr), pl.ds(dj, wo), :].astype(matmul_dtype)

    acc = _accum_taps(tap, w_ref, tr, wo)
    _write_conv_outputs(acc, y_ref, s_ref, q_ref)


def _band_conv_bn_kernel(img_ref, w_ref, mean_ref, istd_ref,
                         y_ref, s_ref, q_ref, band_ref, *, tr, wo):
    """3x3 stride-1 conv with the preceding BN+ReLU fused into the band load.

    The spatial halo of img was padded with a large negative value, so
    relu((pad - m) * istd) == 0 exactly -> correct zero padding for the conv."""
    r = pl.program_id(1)
    band = img_ref[pl.ds(r * tr, tr + 2), :, :].astype(jnp.float32)
    band = jnp.maximum((band - mean_ref[...]) * istd_ref[...], 0.0)
    band_ref[...] = band.astype(band_ref.dtype)

    def tap(di, dj):
        return band_ref[pl.ds(di, tr), pl.ds(dj, wo), :]

    acc = _accum_taps(tap, w_ref, tr, wo)
    _write_conv_outputs(acc, y_ref, s_ref, q_ref)


def _conv1_down_kernel(p_ref, w_ref, xd_ref, wd_ref,
                       y_ref, yd_ref, s1_ref, q1_ref, sd_ref, qd_ref):
    """Downsample conv1 (im2col matmul) + fused 1x1 stride-2 down conv + stats."""
    y = jnp.dot(p_ref[...], w_ref[...], preferred_element_type=jnp.float32)
    yd = jnp.dot(xd_ref[...], wd_ref[...], preferred_element_type=jnp.float32)
    y_ref[...] = y.astype(y_ref.dtype)
    yd_ref[...] = yd.astype(yd_ref.dtype)
    s1_ref[...] = jnp.sum(y, axis=0, keepdims=True)
    q1_ref[...] = jnp.sum(y * y, axis=0, keepdims=True)
    sd_ref[...] = jnp.sum(yd, axis=0, keepdims=True)
    qd_ref[...] = jnp.sum(yd * yd, axis=0, keepdims=True)


def _bn_add_bn_relu_kernel(y_ref, m2_ref, is2_ref, yd_ref, md_ref, isd_ref, o_ref):
    """Final (downsample): bn2(y2) + bn_d(yd) + relu, written at Cout width."""
    cout = o_ref.shape[-1]
    h = (y_ref[...].astype(jnp.float32) - m2_ref[...]) * is2_ref[...]
    r = (yd_ref[...].astype(jnp.float32) - md_ref[...]) * isd_ref[...]
    o_ref[...] = jnp.maximum(h + r, 0.0)[:, :cout].astype(o_ref.dtype)


def _bn_add_relu_identity_kernel(y_ref, m_ref, is_ref, res_ref, o_ref):
    """Final (identity residual): bn2(y2) + x + relu, written at Cout width."""
    cout = o_ref.shape[-1]
    h = (y_ref[...].astype(jnp.float32) - m_ref[...]) * is_ref[...]
    h = h[:, :cout] + res_ref[...].astype(jnp.float32)
    o_ref[...] = jnp.maximum(h, 0.0).astype(o_ref.dtype)


# --------------------------- pallas_call wrappers ----------------------------- #

def _band_conv_call(img, w_taps, mean, istd, *, ho, wo, tr, store_dtype,
                    matmul_dtype, vmem_limit):
    """3x3 stride-1 conv over a per-batch-resident padded image, optional fused
    input BN+ReLU, per-tile stats outputs.  Grid = (B, Ho//tr), both parallel."""
    bsz, hp, wp, ck = img.shape
    cpad = w_taps.shape[-1]
    r_tiles = ho // tr
    t = tr * wo
    n_tiles = bsz * r_tiles
    n = bsz * ho * wo
    fuse = mean is not None

    in_specs = [
        pl.BlockSpec((None, hp, wp, ck), lambda b, r: (b, 0, 0, 0)),   # resident per b
        # TODO(synk): pipeline_mode=pl.Buffered(1) would drop the redundant second
        # buffer for these constant-index weight/stat operands.
        pl.BlockSpec((9, ck, cpad), lambda b, r: (0, 0, 0)),
    ]
    args = [img, w_taps]
    scratch = []
    if fuse:
        in_specs += [pl.BlockSpec((1, cpad), lambda b, r: (0, 0)),
                     pl.BlockSpec((1, cpad), lambda b, r: (0, 0))]
        args += [mean, istd]
        scratch = [pltpu.VMEM((tr + 2, wp, ck), matmul_dtype)]
        kern = functools.partial(_band_conv_bn_kernel, tr=tr, wo=wo)
    else:
        kern = functools.partial(_band_conv_plain_kernel, tr=tr, wo=wo,
                                 matmul_dtype=matmul_dtype)

    out_specs = [
        pl.BlockSpec((None, t, cpad), lambda b, r: (b * r_tiles + r, 0, 0)),
        pl.BlockSpec((None, 1, cpad), lambda b, r: (b * r_tiles + r, 0, 0)),
        pl.BlockSpec((None, 1, cpad), lambda b, r: (b * r_tiles + r, 0, 0)),
    ]
    out_shape = [
        jax.ShapeDtypeStruct((n_tiles, t, cpad), store_dtype),
        jax.ShapeDtypeStruct((n_tiles, 1, cpad), jnp.float32),
        jax.ShapeDtypeStruct((n_tiles, 1, cpad), jnp.float32),
    ]

    flops = 2 * n * 9 * ck * cpad
    bytes_acc = int(img.size * img.dtype.itemsize
                    + w_taps.size * w_taps.dtype.itemsize
                    + n * cpad * jnp.dtype(store_dtype).itemsize
                    + 2 * n_tiles * cpad * 4)
    return pl.pallas_call(
        kern,
        grid=(bsz, r_tiles),
        in_specs=in_specs,
        out_specs=out_specs,
        out_shape=out_shape,
        scratch_shapes=scratch,
        compiler_params=_compiler_params(("parallel", "parallel"), vmem_limit),
        cost_estimate=pl.CostEstimate(flops=flops, transcendentals=0,
                                      bytes_accessed=bytes_acc),
    )(*args)


def _conv1_down_call(p1, w1f, xd, wdf, *, store_dtype, vmem_limit):
    n_tiles, t, k1 = p1.shape
    cin = xd.shape[-1]
    cpad = w1f.shape[-1]
    n = n_tiles * t
    flops = 2 * n * (k1 + cin) * cpad
    bytes_acc = int((n * k1 + k1 * cpad + n * cin + cin * cpad) * p1.dtype.itemsize
                    + 2 * n * cpad * jnp.dtype(store_dtype).itemsize
                    + 4 * n_tiles * cpad * 4)
    stat_spec = pl.BlockSpec((None, 1, cpad), lambda i: (i, 0, 0))
    return pl.pallas_call(
        _conv1_down_kernel,
        grid=(n_tiles,),
        in_specs=[
            pl.BlockSpec((None, t, k1), lambda i: (i, 0, 0)),
            pl.BlockSpec((k1, cpad), lambda i: (0, 0)),
            pl.BlockSpec((None, t, cin), lambda i: (i, 0, 0)),
            pl.BlockSpec((cin, cpad), lambda i: (0, 0)),
        ],
        out_specs=[
            pl.BlockSpec((None, t, cpad), lambda i: (i, 0, 0)),
            pl.BlockSpec((None, t, cpad), lambda i: (i, 0, 0)),
            stat_spec, stat_spec, stat_spec, stat_spec,
        ],
        out_shape=[
            jax.ShapeDtypeStruct((n_tiles, t, cpad), store_dtype),
            jax.ShapeDtypeStruct((n_tiles, t, cpad), store_dtype),
            jax.ShapeDtypeStruct((n_tiles, 1, cpad), jnp.float32),
            jax.ShapeDtypeStruct((n_tiles, 1, cpad), jnp.float32),
            jax.ShapeDtypeStruct((n_tiles, 1, cpad), jnp.float32),
            jax.ShapeDtypeStruct((n_tiles, 1, cpad), jnp.float32),
        ],
        compiler_params=_compiler_params(("parallel",), vmem_limit),
        cost_estimate=pl.CostEstimate(flops=flops, transcendentals=0,
                                      bytes_accessed=bytes_acc),
    )(p1, w1f, xd, wdf)


def down_res_block(x_nchw, params, downsample, domain=-1, *,
                   matmul_dtype=jnp.bfloat16, store_dtype=None):
    """Forward pass of DownResBlock.  Returns (out_NCHW, domain)."""
    # TODO(synk): domain >= 0 selects a domain-conditional norm layer; with the
    # default nn.BatchNorm2d that call path is invalid, so only domain < 0
    # (training-mode batch statistics, affine=False) is implemented.
    if store_dtype is None:
        store_dtype = matmul_dtype
    w1, w2, wd = params["w1"], params["w2"], params["wd"]

    x = jnp.transpose(x_nchw, (0, 2, 3, 1)).astype(jnp.float32)       # NCHW -> NHWC
    B, H, W, cin = x.shape
    cout = w1.shape[-1]
    if not downsample and cin != cout:
        raise ValueError("identity residual requires in_channel == out_channel")
    cpad = _round_up(cout, LANE)
    stride = 2 if downsample else 1
    ho = (H - 1) // stride + 1
    wo = (W - 1) // stride + 1
    n = B * ho * wo

    budget = _vmem_budget_bytes()
    tr = _pick_row_tile(ho, wo, cpad, jnp.dtype(store_dtype).itemsize, budget)
    r_tiles = ho // tr
    t = tr * wo
    n_tiles = B * r_tiles

    # conv1 weights, tap-major, output channels zero-padded to the lane width.
    w1_taps = jnp.pad(w1, ((0, 0), (0, 0), (0, 0), (0, cpad - cout))
                      ).reshape(9, cin, cpad).astype(matmul_dtype)

    if downsample:
        # ---- conv1: 3x3 stride-2 via wrapper-side im2col (output-sized patches).
        # TODO(synk): move this stride-2 patch build in-kernel as well (strided
        # pl.ds loads from the resident band) to drop the last im2col.
        x_sp = jnp.pad(x, ((0, 0), (1, 1), (1, 1), (0, 0)))
        p1 = _im2col_3x3(x_sp, ho, wo, 2).astype(matmul_dtype).reshape(
            n_tiles, t, 9 * cin)
        w1f = w1_taps.reshape(9 * cin, cpad)
        # fused 1x1 stride-2 down-conv operands
        xd = x[:, ::2, ::2, :].reshape(n_tiles, t, cin).astype(matmul_dtype)
        wdf = jnp.pad(wd, ((0, 0), (0, cpad - cout))).astype(matmul_dtype)
        y1, yd, s1, q1, sd, qd = _conv1_down_call(
            p1, w1f, xd, wdf, store_dtype=store_dtype, vmem_limit=budget)
        md, isd = _finalize_stats(sd, qd, n)
    else:
        # ---- conv1: 3x3 stride-1, taps formed in-kernel from a resident image.
        x_img = jnp.pad(x, ((0, 0), (1, 1), (1, 1), (0, 0))).astype(matmul_dtype)
        y1, s1, q1 = _band_conv_call(
            x_img, w1_taps, None, None, ho=ho, wo=wo, tr=tr,
            store_dtype=store_dtype, matmul_dtype=matmul_dtype, vmem_limit=budget)
        yd = md = isd = None
    m1, is1 = _finalize_stats(s1, q1, n)

    # ---- conv2: 3x3 stride-1 with bn1+relu fused into the band load.
    # Spatial halo padded with a large negative value so bn+relu maps it to 0.
    y1_img = y1.reshape(B, ho, wo, cpad)
    y1_pad = jnp.pad(y1_img, ((0, 0), (1, 1), (1, 1), (0, 0)),
                     constant_values=_PAD_NEG)
    w2_taps = jnp.pad(w2, ((0, 0), (0, 0), (0, cpad - cout), (0, cpad - cout))
                      ).reshape(9, cpad, cpad).astype(matmul_dtype)
    y2, s2, q2 = _band_conv_call(
        y1_pad, w2_taps, m1, is1, ho=ho, wo=wo, tr=tr,
        store_dtype=store_dtype, matmul_dtype=matmul_dtype, vmem_limit=budget)
    m2, is2 = _finalize_stats(s2, q2, n)

    # ---- final: bn2 (+ bn_d) + residual + relu, written at Cout width, x dtype.
    out_dtype = x_nchw.dtype
    tile_spec = pl.BlockSpec((None, t, cpad), lambda i: (i, 0, 0))
    stat_spec = pl.BlockSpec((1, cpad), lambda i: (0, 0))
    out_spec = pl.BlockSpec((None, t, cout), lambda i: (i, 0, 0))
    out_shape = jax.ShapeDtypeStruct((n_tiles, t, cout), out_dtype)
    if downsample:
        out = pl.pallas_call(
            _bn_add_bn_relu_kernel,
            grid=(n_tiles,),
            in_specs=[tile_spec, stat_spec, stat_spec,
                      tile_spec, stat_spec, stat_spec],
            out_specs=out_spec,
            out_shape=out_shape,
            compiler_params=_compiler_params(("parallel",), budget),
        )(y2, m2, is2, yd, md, isd)
    else:
        res = x.reshape(n_tiles, t, cin)          # identity residual, unpadded
        out = pl.pallas_call(
            _bn_add_relu_identity_kernel,
            grid=(n_tiles,),
            in_specs=[tile_spec, stat_spec, stat_spec,
                      pl.BlockSpec((None, t, cin), lambda i: (i, 0, 0))],
            out_specs=out_spec,
            out_shape=out_shape,
            compiler_params=_compiler_params(("parallel",), budget),
        )(y2, m2, is2, res)

    out_img = out.reshape(B, ho, wo, cout)
    return jnp.transpose(out_img, (0, 3, 1, 2)), domain


# ------------------------------ pure-JAX reference ---------------------------- #

def _bn_ref(y):
    m = jnp.mean(y, axis=(0, 1, 2), keepdims=True)
    v = jnp.mean(jnp.square(y - m), axis=(0, 1, 2), keepdims=True)
    return (y - m) * jax.lax.rsqrt(v + EPS)


def reference(x_nchw, params, downsample):
    x = jnp.transpose(x_nchw, (0, 2, 3, 1)).astype(jnp.float32)
    dn = ("NHWC", "HWIO", "NHWC")
    stride = 2 if downsample else 1
    h = jax.lax.conv_general_dilated(x, params["w1"], (stride, stride),
                                     ((1, 1), (1, 1)), dimension_numbers=dn)
    h = jnp.maximum(_bn_ref(h), 0.0)
    h = jax.lax.conv_general_dilated(h, params["w2"], (1, 1),
                                     ((1, 1), (1, 1)), dimension_numbers=dn)
    h = _bn_ref(h)
    if downsample:
        wd4 = params["wd"].reshape(1, 1, *params["wd"].shape)
        r = jax.lax.conv_general_dilated(x, wd4, (2, 2),
                                         ((0, 0), (0, 0)), dimension_numbers=dn)
        r = _bn_ref(r)
    else:
        r = x
    out = jnp.maximum(h + r, 0.0)
    return jnp.transpose(out, (0, 3, 1, 2))


# ----------------------------------- main ------------------------------------- #

if __name__ == "__main__":
    key = jax.random.PRNGKey(0)
    k1, k2, k3, kx = jax.random.split(key, 4)
    B, Cin, Cout, H, W = 2, 4, 8, 16, 16

    x = jax.random.normal(kx, (B, Cin, H, W), jnp.float32)

    params = {
        "w1": jax.random.normal(k1, (3, 3, Cin, Cout), jnp.float32) * 0.1,   # conv1 3x3
        "w2": jax.random.normal(k2, (3, 3, Cout, Cout), jnp.float32) * 0.1,  # conv2 3x3
        "wd": jax.random.normal(k3, (Cin, Cout), jnp.float32) * 0.1,         # down 1x1
    }
    params_nd = {
        "w1": jax.random.normal(k1, (3, 3, Cin, Cin), jnp.float32) * 0.1,
        "w2": jax.random.normal(k2, (3, 3, Cin, Cin), jnp.float32) * 0.1,
        "wd": jax.random.normal(k3, (Cin, Cin), jnp.float32) * 0.1,          # unused
    }

    # --- f32 mode, downsample=True: tight check vs the XLA reference
    out, dom = down_res_block(x, params, downsample=True,
                              matmul_dtype=jnp.float32)
    out = jax.block_until_ready(out)
    ref = reference(x, params, downsample=True)
    assert out.shape == (B, Cout, H // 2, W // 2)
    assert dom == -1
    assert jnp.allclose(out, ref, rtol=2e-4, atol=2e-4), \
        float(jnp.max(jnp.abs(out - ref)))

    # --- f32 mode, downsample=False (identity residual)
    out2, _ = down_res_block(x, params_nd, downsample=False,
                             matmul_dtype=jnp.float32)
    out2 = jax.block_until_ready(out2)
    ref2 = reference(x, params_nd, downsample=False)
    assert out2.shape == (B, Cin, H, W)
    assert jnp.allclose(out2, ref2, rtol=2e-4, atol=2e-4), \
        float(jnp.max(jnp.abs(out2 - ref2)))

    # --- default bf16 MXU-feed / bf16 intermediates (all-generation perf mode)
    out3, _ = down_res_block(x, params, downsample=True)
    out3 = jax.block_until_ready(out3)
    assert jnp.allclose(out3, ref, rtol=1e-1, atol=1e-1), \
        float(jnp.max(jnp.abs(out3 - ref)))

    out4, _ = down_res_block(x, params_nd, downsample=False)
    out4 = jax.block_until_ready(out4)
    assert jnp.allclose(out4, ref2, rtol=1e-1, atol=1e-1), \
        float(jnp.max(jnp.abs(out4 - ref2)))

    print("KERNEL_OK")
</pallas_src>

<mosaic_0001>
module attributes {stable_mosaic.version = 11 : i64} {
  func.func @_conv1_down_kernel(%arg0: i32, %arg1: memref<1x64x36xf32, #tpu.memory_space<vmem>>, %arg2: memref<36x128xf32, #tpu.memory_space<vmem>>, %arg3: memref<1x64x4xf32, #tpu.memory_space<vmem>>, %arg4: memref<4x128xf32, #tpu.memory_space<vmem>>, %arg5: memref<1x64x128xf32, #tpu.memory_space<vmem>>, %arg6: memref<1x64x128xf32, #tpu.memory_space<vmem>>, %arg7: memref<1x1x128xf32, #tpu.memory_space<vmem>>, %arg8: memref<1x1x128xf32, #tpu.memory_space<vmem>>, %arg9: memref<1x1x128xf32, #tpu.memory_space<vmem>>, %arg10: memref<1x1x128xf32, #tpu.memory_space<vmem>>) attributes {dimension_semantics = [#tpu.dimension_semantics<parallel>], iteration_bounds = array<i64: 2>, scalar_prefetch = 0 : i64, scratch_operands = 0 : i64, tpu.core_type = #tpu.core_type<tc>, window_params = [{transform_indices = @transform_0, window_bounds = array<i64: 1, 64, 36>}, {pipeline_mode = #tpu.pipeline_mode<synchronous>, transform_indices = @transform_1, window_bounds = array<i64: 36, 128>}, {transform_indices = @transform_2, window_bounds = array<i64: 1, 64, 4>}, {pipeline_mode = #tpu.pipeline_mode<synchronous>, transform_indices = @transform_3, window_bounds = array<i64: 4, 128>}, {transform_indices = @transform_4, window_bounds = array<i64: 1, 64, 128>}, {transform_indices = @transform_5, window_bounds = array<i64: 1, 64, 128>}, {transform_indices = @transform_6, window_bounds = array<i64: 1, 1, 128>}, {transform_indices = @transform_7, window_bounds = array<i64: 1, 1, 128>}, {transform_indices = @transform_8, window_bounds = array<i64: 1, 1, 128>}, {transform_indices = @transform_9, window_bounds = array<i64: 1, 1, 128>}]} {
    %c0 = arith.constant 0 : index
    %c0_0 = arith.constant 0 : index
    %c0_1 = arith.constant 0 : index
    %0 = vector.load %arg1[%c0, %c0_0, %c0_1] : memref<1x64x36xf32, #tpu.memory_space<vmem>>, vector<1x64x36xf32>
    %1 = vector.shape_cast %0 : vector<1x64x36xf32> to vector<64x36xf32>
    %c0_2 = arith.constant 0 : index
    %c0_3 = arith.constant 0 : index
    %2 = vector.load %arg2[%c0_2, %c0_3] : memref<36x128xf32, #tpu.memory_space<vmem>>, vector<36x128xf32>
    %cst = arith.constant dense<0.000000e+00> : vector<64x128xf32>
    %3 = tpu.matmul %1, %2, %cst {dimension_numbers = #tpu.dot_dimension_numbers<[1], [0], [0], [1], [0, 0, 1, 1], [], []>} : vector<64x36xf32>, vector<36x128xf32>, vector<64x128xf32> -> vector<64x128xf32>
    %c0_4 = arith.constant 0 : index
    %c0_5 = arith.constant 0 : index
    %c0_6 = arith.constant 0 : index
    %4 = vector.load %arg3[%c0_4, %c0_5, %c0_6] : memref<1x64x4xf32, #tpu.memory_space<vmem>>, vector<1x64x4xf32>
    %5 = vector.shape_cast %4 : vector<1x64x4xf32> to vector<64x4xf32>
    %c0_7 = arith.constant 0 : index
    %c0_8 = arith.constant 0 : index
    %6 = vector.load %arg4[%c0_7, %c0_8] : memref<4x128xf32, #tpu.memory_space<vmem>>, vector<4x128xf32>
    %cst_9 = arith.constant dense<0.000000e+00> : vector<64x128xf32>
    %7 = tpu.matmul %5, %6, %cst_9 {dimension_numbers = #tpu.dot_dimension_numbers<[1], [0], [0], [1], [0, 0, 1, 1], [], []>} : vector<64x4xf32>, vector<4x128xf32>, vector<64x128xf32> -> vector<64x128xf32>
    %c0_10 = arith.constant 0 : index
    %c0_11 = arith.constant 0 : index
    %c0_12 = arith.constant 0 : index
    %8 = vector.load %arg5[%c0_10, %c0_11, %c0_12] : memref<1x64x128xf32, #tpu.memory_space<vmem>>, vector<1x64x128xf32>
    %9 = vector.shape_cast %8 : vector<1x64x128xf32> to vector<64x128xf32>
    %10 = vector.shape_cast %3 : vector<64x128xf32> to vector<1x64x128xf32>
    tpu.vector_store %arg5[%c0_10, %c0_11, %c0_12], %10 {strides = array<i32>} : memref<1x64x128xf32, #tpu.memory_space<vmem>>, vector<1x64x128xf32>,
    %c0_13 = arith.constant 0 : index
    %c0_14 = arith.constant 0 : index
    %c0_15 = arith.constant 0 : index
    %11 = vector.load %arg6[%c0_13, %c0_14, %c0_15] : memref<1x64x128xf32, #tpu.memory_space<vmem>>, vector<1x64x128xf32>
    %12 = vector.shape_cast %11 : vector<1x64x128xf32> to vector<64x128xf32>
    %13 = vector.shape_cast %7 : vector<64x128xf32> to vector<1x64x128xf32>
    tpu.vector_store %arg6[%c0_13, %c0_14, %c0_15], %13 {strides = array<i32>} : memref<1x64x128xf32, #tpu.memory_space<vmem>>, vector<1x64x128xf32>,
    %cst_16 = arith.constant dense<0.000000e+00> : vector<128xf32>
    %14 = vector.multi_reduction <add>, %3, %cst_16 [0] : vector<64x128xf32> to vector<128xf32>
    %15 = vector.shape_cast %14 : vector<128xf32> to vector<1x128xf32>
    %c0_17 = arith.constant 0 : index
    %c0_18 = arith.constant 0 : index
    %c0_19 = arith.constant 0 : index
    %16 = vector.load %arg7[%c0_17, %c0_18, %c0_19] : memref<1x1x128xf32, #tpu.memory_space<vmem>>, vector<1x1x128xf32>
    %17 = vector.shape_cast %16 : vector<1x1x128xf32> to vector<1x128xf32>
    %18 = vector.shape_cast %15 : vector<1x128xf32> to vector<1x1x128xf32>
    tpu.vector_store %arg7[%c0_17, %c0_18, %c0_19], %18 {strides = array<i32>} : memref<1x1x128xf32, #tpu.memory_space<vmem>>, vector<1x1x128xf32>,
    %19 = arith.mulf %3, %3 : vector<64x128xf32>
    %cst_20 = arith.constant dense<0.000000e+00> : vector<128xf32>
    %20 = vector.multi_reduction <add>, %19, %cst_20 [0] : vector<64x128xf32> to vector<128xf32>
    %21 = vector.shape_cast %20 : vector<128xf32> to vector<1x128xf32>
    %c0_21 = arith.constant 0 : index
    %c0_22 = arith.constant 0 : index
    %c0_23 = arith.constant 0 : index
    %22 = vector.load %arg8[%c0_21, %c0_22, %c0_23] : memref<1x1x128xf32, #tpu.memory_space<vmem>>, vector<1x1x128xf32>
    %23 = vector.shape_cast %22 : vector<1x1x128xf32> to vector<1x128xf32>
    %24 = vector.shape_cast %21 : vector<1x128xf32> to vector<1x1x128xf32>
    tpu.vector_store %arg8[%c0_21, %c0_22, %c0_23], %24 {strides = array<i32>} : memref<1x1x128xf32, #tpu.memory_space<vmem>>, vector<1x1x128xf32>,
    %cst_24 = arith.constant dense<0.000000e+00> : vector<128xf32>
    %25 = vector.multi_reduction <add>, %7, %cst_24 [0] : vector<64x128xf32> to vector<128xf32>
    %26 = vector.shape_cast %25 : vector<128xf32> to vector<1x128xf32>
    %c0_25 = arith.constant 0 : index
    %c0_26 = arith.constant 0 : index
    %c0_27 = arith.constant 0 : index
    %27 = vector.load %arg9[%c0_25, %c0_26, %c0_27] : memref<1x1x128xf32, #tpu.memory_space<vmem>>, vector<1x1x128xf32>
    %28 = vector.shape_cast %27 : vector<1x1x128xf32> to vector<1x128xf32>
    %29 = vector.shape_cast %26 : vector<1x128xf32> to vector<1x1x128xf32>
    tpu.vector_store %arg9[%c0_25, %c0_26, %c0_27], %29 {strides = array<i32>} : memref<1x1x128xf32, #tpu.memory_space<vmem>>, vector<1x1x128xf32>,
    %30 = arith.mulf %7, %7 : vector<64x128xf32>
    %cst_28 = arith.constant dense<0.000000e+00> : vector<128xf32>
    %31 = vector.multi_reduction <add>, %30, %cst_28 [0] : vector<64x128xf32> to vector<128xf32>
    %32 = vector.shape_cast %31 : vector<128xf32> to vector<1x128xf32>
    %c0_29 = arith.constant 0 : index
    %c0_30 = arith.constant 0 : index
    %c0_31 = arith.constant 0 : index
    %33 = vector.load %arg10[%c0_29, %c0_30, %c0_31] : memref<1x1x128xf32, #tpu.memory_space<vmem>>, vector<1x1x128xf32>
    %34 = vector.shape_cast %33 : vector<1x1x128xf32> to vector<1x128xf32>
    %35 = vector.shape_cast %32 : vector<1x128xf32> to vector<1x1x128xf32>
    tpu.vector_store %arg10[%c0_29, %c0_30, %c0_31], %35 {strides = array<i32>} : memref<1x1x128xf32, #tpu.memory_space<vmem>>, vector<1x1x128xf32>,
    return
  }
  func.func @transform_0(%arg0: i32) -> (i32, i32, i32) {
    %c0_i32 = arith.constant 0 : i32
    %c0_i32_0 = arith.constant 0 : i32
    %c0_i32_1 = arith.constant 0 : i32
    return %arg0, %c0_i32, %c0_i32_0 : i32, i32, i32
  }
  func.func @transform_1(%arg0: i32) -> (i32, i32) {
    %c0_i32 = arith.constant 0 : i32
    %c0_i32_0 = arith.constant 0 : i32
    %c0_i32_1 = arith.constant 0 : i32
    return %c0_i32, %c0_i32_0 : i32, i32
  }
  func.func @transform_2(%arg0: i32) -> (i32, i32, i32) {
    %c0_i32 = arith.constant 0 : i32
    %c0_i32_0 = arith.constant 0 : i32
    %c0_i32_1 = arith.constant 0 : i32
    return %arg0, %c0_i32, %c0_i32_0 : i32, i32, i32
  }
  func.func @transform_3(%arg0: i32) -> (i32, i32) {
    %c0_i32 = arith.constant 0 : i32
    %c0_i32_0 = arith.constant 0 : i32
    %c0_i32_1 = arith.constant 0 : i32
    return %c0_i32, %c0_i32_0 : i32, i32
  }
  func.func @transform_4(%arg0: i32) -> (i32, i32, i32) {
    %c0_i32 = arith.constant 0 : i32
    %c0_i32_0 = arith.constant 0 : i32
    %c0_i32_1 = arith.constant 0 : i32
    return %arg0, %c0_i32, %c0_i32_0 : i32, i32, i32
  }
  func.func @transform_5(%arg0: i32) -> (i32, i32, i32) {
    %c0_i32 = arith.constant 0 : i32
    %c0_i32_0 = arith.constant 0 : i32
    %c0_i32_1 = arith.constant 0 : i32
    return %arg0, %c0_i32, %c0_i32_0 : i32, i32, i32
  }
  func.func @transform_6(%arg0: i32) -> (i32, i32, i32) {
    %c0_i32 = arith.constant 0 : i32
    %c0_i32_0 = arith.constant 0 : i32
    %c0_i32_1 = arith.constant 0 : i32
    return %arg0, %c0_i32, %c0_i32_0 : i32, i32, i32
  }
  func.func @transform_7(%arg0: i32) -> (i32, i32, i32) {
    %c0_i32 = arith.constant 0 : i32
    %c0_i32_0 = arith.constant 0 : i32
    %c0_i32_1 = arith.constant 0 : i32
    return %arg0, %c0_i32, %c0_i32_0 : i32, i32, i32
  }
  func.func @transform_8(%arg0: i32) -> (i32, i32, i32) {
    %c0_i32 = arith.constant 0 : i32
    %c0_i32_0 = arith.constant 0 : i32
    %c0_i32_1 = arith.constant 0 : i32
    return %arg0, %c0_i32, %c0_i32_0 : i32, i32, i32
  }
  func.func @transform_9(%arg0: i32) -> (i32, i32, i32) {
    %c0_i32 = arith.constant 0 : i32
    %c0_i32_0 = arith.constant 0 : i32
    %c0_i32_1 = arith.constant 0 : i32
    return %arg0, %c0_i32, %c0_i32_0 : i32, i32, i32
  }
}

</mosaic_0001>

<bundles_post_ra>
// kernel: tpu_custom_call.1
= control target key start
LH: loop header
LB: loop body
LE: loop exit
PB: predicated region body
PF: predicated region fallthrough
CT: control target
= control target key end

     0   :  { %s1685_s0 = inlined_call_operand.vmem [shape: f32[2,64,36], index: 0, kind: input, shape index: {}]   ;;  %s1686_s1 = inlined_call_operand.vmem [shape: f32[36,128], index: 1, kind: input, shape index: {}]   ;;  %s1687_s2 = inlined_call_operand.vmem [shape: f32[2,64,4], index: 2, kind: input, shape index: {}]   ;;  %s1688_s3 = inlined_call_operand.vmem [shape: f32[4,128], index: 3, kind: input, shape index: {}]   ;;  %s1689_s4 = inlined_call_operand.hbm [shape: f32[2,64,128], index: 4, kind: output, shape index: {0}]   ;;  %s1690_s5 = inlined_call_operand.hbm [shape: f32[2,64,128], index: 5, kind: output, shape index: {1}]   ;;  %s1691_s6 = inlined_call_operand.hbm [shape: f32[2,1,128], index: 6, kind: output, shape index: {2}]   ;;  %s1692_s7 = inlined_call_operand.hbm [shape: f32[2,1,128], index: 7, kind: output, shape index: {3}]   ;;  %s1693_s8 = inlined_call_operand.hbm [shape: f32[2,1,128], index: 8, kind: output, shape index: {4}]   ;;  %s1694_s9 = inlined_call_operand.hbm [shape: f32[2,1,128], index: 9, kind: output, shape index: {5}]  }
   0x1   :  { %1702 = sst [smem:[#allocation19_spill]] %s1685_s0 }
   0x2   :  { %1703 = sst [smem:[#allocation20_spill]] %s1686_s1 }
   0x3   :  { %1704 = sst [smem:[#allocation21_spill]] %s1687_s2 }
   0x4   :  { %1705 = sst [smem:[#allocation22_spill]] %s1688_s3 }
   0x5   :  { %1706 = sst [smem:[#allocation23_spill]] %s1689_s4 }
   0x6   :  { %15 = vsyncpa [#allocation3], 0 }
   0x7   :  { %17 = vsyncpa [#allocation3 + $0x1], 0 }
   0x8   :  { %18 = vsyncpa [#allocation5], 0 }
   0x9   :  { %20 = vsyncpa [#allocation5 + $0x1], 0 }
   0xa   :  { %21 = vsyncpa [#allocation8], 0 }
   0xb   :  { %23 = vsyncpa [#allocation8 + $0x1], 0 }
   0xc   :  { %24 = vsyncpa [#allocation11], 0 }
   0xd   :  { %26 = vsyncpa [#allocation11 + $0x1], 0  ;;  %s1340_s30 = smov 0   ;;  %s1342_s10 = smov 0  }
   0xe   :  { %s1344_s11 = smov 0   ;;  %s1346_s12 = smov 0  }
   0xf LB: > { %s1361_s13 = sadd.s32 4294967295, %s1286_s12   ;;  %s1695_s14 = sadd.s32 4294967294, %s1286_s12   ;;  %s1286_s12 = sphi %s1346_s12, %s1732_s12   ;;  %s1282_s11 = sphi %s1344_s11, %s1731_s11   ;;  %s1278_s10 = sphi %s1342_s10, %s1730_s10   ;;  %s1274_s30 = sphi %s1340_s30, %s1729_s30  }
  0x10   : > { %s1365_s15 = sadd.s32 1, %s1286_s12   ;;  %s133_s16 = sadd.s32 1, %s1282_s11 }
  0x11   : > { %s130_s17 = ssub.s32 %s1286_s12, %s1365_s15  ;;  %p143_p0 = scmp.ne.s32.totalorder %s1282_s11, %s1278_s10 }
  0x12   : > { %p131_p1 = scmp.eq.s32.totalorder %s130_s17, 0  ;;  %p144_p2 = scmp.eq.s32.totalorder %s1361_s13, 1 }
  0x13   : > { %p149_p3 = scmp.ne.s32.totalorder %s1278_s10, %s1274_s30  ;;  %p150_p4 = scmp.eq.s32.totalorder %s1695_s14, 1 }
  0x14   : > { %s1378_s18 = scalar_select %p131_p1, %s1282_s11, %s133_s16  }
  0x15   : > { %p1380_p5 = por %p144_p2, %p143_p0  ;;  %p1384_p6 = por %p150_p4, %p149_p3 }
  0x16   : > { %p963_p7 = scmp.ge.s32.totalorder %s1286_s12, 1  ;;  %p320_p8 = scmp.lt.s32.totalorder %s1286_s12, 3 }
  0x18   : > { %p321_p9 = pnand %p963_p7, %p320_p8 }
  0x1a   : > { %324 = sbr.rel (%p321_p9) target bundleno = 284 (0x11c), region = 36 }
  0x1f   : > { %s1709_s1 = sld [smem:[#allocation20_spill]]  ;;  %vm430_vm0 = vcmask 1043456   ;;  %p382_p10 = scmp.lt.s32.totalorder %s1361_s13, 1  ;;  %vm484_vm1 = vcmask 31744   ;;  %vm405_vm2 = vcmask 293888  }
  0x20   : > { %s1710_s3 = sld [smem:[#allocation22_spill]]  ;;  %s1453_s16 = sand.u32 1, %s1278_s10  }
  0x21   : > { %s383_s29 = scalar_select %p382_p10, %s1361_s13, 1 }
  0x22   : > { %s1711_s2 = sld [smem:[#allocation21_spill]]  ;;  %s964_s17 = sshll.u32 %s1453_s16, 6 }
  0x23   : > { %s996_s21 = sshll.u32 %s383_s29, 6  ;;  %s1712_s0 = sld [smem:[#allocation19_spill]] }
  0x24   : > { %s1459_s22 = scalar_lea.vmem [#allocation2], %s964_s17  ;;  %s998_s23 = sshll.u32 %s1361_s13, 6 }
  0x25   : > { %v404_v0 = vld [vmem:[%s1709_s1 + $0x20] sm:$0xf]  ;;  %v403_v1 = vld [vmem:[%s1709_s1 + $0x18] sm:$0xff]  ;;  %v402_v3 = vld [vmem:[%s1709_s1 + $0x10] sm:$0xff]  ;;  %s1713_s4 = sld [smem:[#allocation23_spill]]  ;;  %s675_s14 = sshll.u32 %s1459_s22, 4  ;;  %s1498_s14 = int_to_ptr.vmem [resolvable:$true] %s675_s14 }
  0x26   : > { %970 = vmatpush.msk.msra.mxu0 %vm430_vm0, %v404_v0  ;;  %1000 = vmatpush.msk.msra.mxu2 %vm430_vm0, %v404_v0  ;;  %v483_v2 = vld [vmem:[%s1710_s3] sm:$0xf]  ;;  %v401_v4 = vld [vmem:[%s1709_s1 + $0x8] sm:$0xff] }
  0x27   : > { %979 = vmatpush.msk.msra.mxu1 %vm430_vm0, %v483_v2  ;;  %1005 = vmatpush.msk.msra.mxu3 %vm430_vm0, %v483_v2  ;;  %v400_v6 = vld [vmem:[%s1709_s1] sm:$0xff] }
  0x28   : > { %446 = vmatpush.msra.mxu0 %v403_v1  ;;  %1001 = vmatpush.msra.mxu2 %v403_v1  ;;  %s1410_s24 = scalar_lea.vmem %s1711_s2, %s996_s21 }
  0x29   : > { %s1415_s27 = scalar_lea.vmem %s1712_s0, %s996_s21  ;;  %v475_v5 = vld [vmem:[%s1410_s24] sm:$0xff]  ;;  %v480_v9 = vld [vmem:[%s1410_s24 + $0x28] sm:$0xff]  ;;  %v481_v11 = vld [vmem:[%s1410_s24 + $0x30] sm:$0xff]  ;;  %s1456_s21 = scalar_lea.vmem [#allocation4], %s964_s17 }
  0x2a   : > { %447 = vmatpush.msra.mxu0 %v402_v3  ;;  %1002 = vmatpush.msra.mxu2 %v402_v3  ;;  %v392_v7 = vld [vmem:[%s1415_s27] sm:$0xff]  ;;  %v476_v10 = vld [vmem:[%s1410_s24 + $0x8] sm:$0xff]  ;;  %v477_v14 = vld [vmem:[%s1410_s24 + $0x10] sm:$0xff]  ;;  %s692_s25 = sshll.u32 %s1456_s21, 4  ;;  %s1092_s0 = scalar_lea.hbm %s1690_s5, 128  ;;  %s1493_s25 = int_to_ptr.vmem [resolvable:$true] %s692_s25 }
  0x2b   : > { %980 = vmatmul.msk.f32.vlgmr.msra.gmra.mxu1 %vm484_vm1, %v475_v5  ;;  %v396_v8 = vld [vmem:[%s1415_s27 + $0x20] sm:$0xff]  ;;  %985 = vmatmul.msk.f32.vlgmr.msra.gmra.mxu3 %vm484_vm1, %v480_v9  ;;  %v393_v12 = vld [vmem:[%s1415_s27 + $0x8] sm:$0xff]  ;;  %v482_v15 = vld [vmem:[%s1410_s24 + $0x38] sm:$0xff]  ;;  %s674_s17 = scalar_lea.hbm %s1713_s4, %s998_s23 }
  0x2c   : > { %448 = vmatpush.msra.mxu0 %v401_v4  ;;  %1003 = vmatpush.msra.mxu2 %v401_v4  ;;  %v397_v13 = vld [vmem:[%s1415_s27 + $0x28] sm:$0xff]  ;;  %v394_v16 = vld [vmem:[%s1415_s27 + $0x10] sm:$0xff]  ;;  %v478_v18 = vld [vmem:[%s1410_s24 + $0x18] sm:$0xff] }
  0x2d   : > { %v398_v17 = vld [vmem:[%s1415_s27 + $0x30] sm:$0xff]  ;;  %v395_v19 = vld [vmem:[%s1415_s27 + $0x18] sm:$0xff]  ;;  %v479_v21 = vld [vmem:[%s1410_s24 + $0x20] sm:$0xff]  ;;  %s677_s24 = sshll.u32 %s674_s17, 4  ;;  %s1500_s24 = int_to_ptr.hbm [resolvable:$true] %s677_s24 }
  0x2e   : > { %449 = vmatpush.msra.mxu0 %v400_v6  ;;  %1004 = vmatpush.msra.mxu2 %v400_v6  ;;  %v399_v20 = vld [vmem:[%s1415_s27 + $0x38] sm:$0xff]  ;;  %s691_s27 = scalar_lea.hbm %s1690_s5, %s998_s23  ;;  %s1714_s23 = sand.u32 1, %s1361_s13  }
  0x2f   : > { %971 = vmatmul.msk.f32.vlgmr.msra.gmra.mxu0 %vm405_vm2, %v392_v7  ;;  %975 = vmatmul.msk.f32.vlgmr.msra.gmra.mxu2 %vm405_vm2, %v396_v8  ;;  %s694_s26 = sshll.u32 %s691_s27, 4  ;;  %s1504_s27 = scalar_lea.sflag [#allocation5], %s1714_s23  ;;  %s1495_s26 = int_to_ptr.hbm [resolvable:$true] %s694_s26 }
  0x30   : > { %s1086_s28 = sshra.s32 %s1495_s26, 4  ;;  %s1087_s28 = int_to_ptr.hbm [resolvable:$true] %s1086_s28 }
  0x31   : > { %s1088_s29 = scalar_lea.hbm %s1087_s28, 64  ;;  %p1093_p0 = scmp.lt.s32.totalorder %s1087_s28, %s1690_s5 }
  0x32   : > { %p1089_p11 = scmp.ne.s32.totalorder %s1087_s28, %s1088_s29  ;;  %p1094_p1 = scmp.lt.s32.totalorder %s1092_s0, %s1088_s29 }
  0x33   : > { %981 = vmatmul.msk.f32.gmra.mxu1 %vm484_vm1, %v476_v10  ;;  %986 = vmatmul.msk.f32.gmra.mxu3 %vm484_vm1, %v481_v11 }
  0x34   : > { %p1090_p12 = pnand %p1089_p11, %p1380_p5  ;;  %p1095_p2 = por %p1094_p1, %p1093_p0 }
  0x36   : > { %p1091_p13 = pneg %p1090_p12 }
  0x37   : > { %972 = vmatmul.msk.f32.gmra.mxu0 %vm405_vm2, %v393_v12  ;;  %976 = vmatmul.msk.f32.gmra.mxu2 %vm405_vm2, %v397_v13 }
  0x38   : > { %p1096_p3 = pnand %p1095_p2, %p1091_p13 }
  0x3b   : > { %982 = vmatmul.msk.f32.gmra.mxu1 %vm484_vm1, %v477_v14  ;;  %987 = vmatmul.msk.f32.gmra.mxu3 %vm484_vm1, %v482_v15 }
  0x3f   : > { %973 = vmatmul.msk.f32.gmra.mxu0 %vm405_vm2, %v394_v16  ;;  %977 = vmatmul.msk.f32.gmra.mxu2 %vm405_vm2, %v398_v17 }
  0x43   : > { %983 = vmatmul.msk.f32.gmra.mxu1 %vm484_vm1, %v478_v18 }
  0x47   : > { %974 = vmatmul.msk.f32.gmra.mxu0 %vm405_vm2, %v395_v19  ;;  %978 = vmatmul.msk.f32.gmra.mxu2 %vm405_vm2, %v399_v20 }
  0x4b   : > { %984 = vmatmul.msk.f32.gmra.mxu1 %vm484_vm1, %v479_v21 }
  0xa8   : > { %v529_v22 = vpop.f32.mrf.mxu1 }
  0xa9   : > { %561 = vst [vmem:[%s1456_s21] sm:$0xff] %v529_v22  ;;  %v619_v42 = vmul.f32 %v529_v22, %v529_v22 }
  0xac   : > { %v451_v23 = vpop.f32.mrf.mxu0 }
  0xad   : > { %553 = vst [vmem:[%s1459_s22] sm:$0xff] %v451_v23  ;;  %v583_v33 = vmul.f32 %v451_v23, %v451_v23 }
  0xae   : > { %v1462_v25 = vpop.f32.mrf.mxu3 }
  0xaf   : > { %566 = vst [vmem:[%s1456_s21 + $0x28] sm:$0xff] %v1462_v25 }
  0xb0   : > { %v532_v24 = vpop.f32.mrf.mxu1 }
  0xb1   : > { %562 = vst [vmem:[%s1456_s21 + $0x8] sm:$0xff] %v532_v24  ;;  %v620_v38 = vmul.f32 %v532_v24, %v532_v24  ;;  %v605_v43 = vadd.f32 %v532_v24, %v529_v22 }
  0xb2   : > { %v463_v26 = vpop.f32.mrf.mxu2 }
  0xb3   : > { %557 = vst [vmem:[%s1459_s22 + $0x20] sm:$0xff] %v463_v26  ;;  %v627_v49 = vadd.f32 %v620_v38, %v619_v42  ;;  %v587_v52 = vmul.f32 %v463_v26, %v463_v26 }
  0xb4   : > { %v454_v27 = vpop.f32.mrf.mxu0 }
  0xb5   : > { %554 = vst [vmem:[%s1459_s22 + $0x8] sm:$0xff] %v454_v27  ;;  %v584_v32 = vmul.f32 %v454_v27, %v454_v27  ;;  %v569_v34 = vadd.f32 %v454_v27, %v451_v23 }
  0xb6   : > { %v1469_v29 = vpop.f32.mrf.mxu3 }
  0xb7   : > { %567 = vst [vmem:[%s1456_s21 + $0x30] sm:$0xff] %v1469_v29  ;;  %v591_v39 = vadd.f32 %v584_v32, %v583_v33 }
  0xb8   : > { %v535_v28 = vpop.f32.mrf.mxu1 }
  0xb9   : > { %563 = vst [vmem:[%s1456_s21 + $0x10] sm:$0xff] %v535_v28  ;;  %v621_v44 = vmul.f32 %v535_v28, %v535_v28  ;;  %v606_v50 = vadd.f32 %v605_v43, %v535_v28 }
  0xba   : > { %v466_v30 = vpop.f32.mrf.mxu2 }
  0xbb   : > { %558 = vst [vmem:[%s1459_s22 + $0x28] sm:$0xff] %v466_v30  ;;  %v628_v55 = vadd.f32 %v627_v49, %v621_v44  ;;  %v588_v57 = vmul.f32 %v466_v30, %v466_v30 }
  0xbc   : > { %v457_v31 = vpop.f32.mrf.mxu0 }
  0xbd   : > { %555 = vst [vmem:[%s1459_s22 + $0x10] sm:$0xff] %v457_v31  ;;  %v585_v35 = vmul.f32 %v457_v31, %v457_v31  ;;  %v570_v40 = vadd.f32 %v569_v34, %v457_v31 }
  0xbe   : > { %v1477_v37 = vpop.f32.mrf.mxu3 }
  0xbf   : > { %568 = vst [vmem:[%s1456_s21 + $0x38] sm:$0xff] %v1477_v37  ;;  %v592_v46 = vadd.f32 %v591_v39, %v585_v35 }
  0xc0   : > { %v538_v36 = vpop.f32.mrf.mxu1 }
  0xc1   : > { %564 = vst [vmem:[%s1456_s21 + $0x18] sm:$0xff] %v538_v36  ;;  %v622_v51 = vmul.f32 %v538_v36, %v538_v36  ;;  %v607_v56 = vadd.f32 %v606_v50, %v538_v36 }
  0xc2   : > { %v469_v41 = vpop.f32.mrf.mxu2 }
  0xc3   : > { %559 = vst [vmem:[%s1459_s22 + $0x30] sm:$0xff] %v469_v41  ;;  %v629_v61 = vadd.f32 %v628_v55, %v622_v51  ;;  %v589_v1 = vmul.f32 %v469_v41, %v469_v41 }
  0xc4   : > { %v460_v45 = vpop.f32.mrf.mxu0 }
  0xc5   : > { %556 = vst [vmem:[%s1459_s22 + $0x18] sm:$0xff] %v460_v45  ;;  %v571_v47 = vadd.f32 %v570_v40, %v460_v45  ;;  %v586_v48 = vmul.f32 %v460_v45, %v460_v45 }
  0xc7   : > { %v572_v53 = vadd.f32 %v571_v47, %v463_v26  ;;  %v593_v54 = vadd.f32 %v592_v46, %v586_v48 }
  0xc8   : > { %v541_v60 = vpop.f32.mrf.mxu1 }
  0xc9   : > { %v594_v58 = vadd.f32 %v593_v54, %v587_v52  ;;  %v573_v59 = vadd.f32 %v572_v53, %v466_v30  ;;  %565 = vst [vmem:[%s1456_s21 + $0x20] sm:$0xff] %v541_v60  ;;  %v608_v62 = vadd.f32 %v607_v56, %v541_v60  ;;  %v623_v63 = vmul.f32 %v541_v60, %v541_v60 }
  0xca   : > { %v472_v3 = vpop.f32.mrf.mxu2 }
  0xcb   : > { %v574_v0 = vadd.f32 %v573_v59, %v469_v41  ;;  %v595_v2 = vadd.f32 %v594_v58, %v588_v57 }
  0xcc   : > { %1099 = shalt.err (!%p1096_p3)
}
  0xcd   : > { %s1288_s23 = smov 128   ;;  %s1289_s3 = smov 8   ;;  %v624_v4 = vmul.f32 %v1462_v25, %v1462_v25  ;;  %v609_v5 = vadd.f32 %v608_v62, %v1462_v25  ;;  %v630_v6 = vadd.f32 %v629_v61, %v623_v63  ;;  %560 = vst [vmem:[%s1459_s22 + $0x38] sm:$0xff] %v472_v3  ;;  %v590_v7 = vmul.f32 %v472_v3, %v472_v3 }
  0xce   : > { %1007 = dma.vmem_to_hbm [thread:$0]  (%p1380_p5), %s1493_s25, 1024, %s1495_s26, %s1504_s27, %s1288_s23, %s1288_s23, %s1289_s3   ;;  %v596_v8 = vadd.f32 %v595_v2, %v589_v1  ;;  %v575_v9 = vadd.f32 %v574_v0, %v472_v3 }
  0xcf   : > { %s642_s0 = scalar_lea.sflag [#allocation3], %s1453_s16  ;;  %s1114_s1 = sshra.s32 %s1500_s24, 4  ;;  %s1115_s1 = int_to_ptr.hbm [resolvable:$true] %s1114_s1 }
  0xd0   : > { %s1116_s2 = scalar_lea.hbm %s1115_s1, 64  ;;  %s1120_s26 = scalar_lea.hbm %s1713_s4, 128 }
  0xd1   : > { %p1117_p4 = scmp.ne.s32.totalorder %s1115_s1, %s1116_s2  ;;  %p1121_p9 = scmp.lt.s32.totalorder %s1115_s1, %s1713_s4 }
  0xd2   : > { %p1122_p10 = scmp.lt.s32.totalorder %s1120_s26, %s1116_s2 }
  0xd3   : > { %p1118_p7 = pnand %p1117_p4, %p1380_p5 }
  0xd4   : > { %p1123_p11 = por %p1122_p10, %p1121_p9 }
  0xd5   : > { %p1119_p8 = pneg %p1118_p7 }
  0xd7   : > { %p1124_p12 = pnand %p1123_p11, %p1119_p8 }
  0xd9   : > { %1127 = shalt.err (!%p1124_p12)
}
  0xda   : > { %1006 = dma.vmem_to_hbm [thread:$0]  (%p1380_p5), %s1498_s14, 1024, %s1500_s24, %s642_s0, %s1288_s23, %s1288_s23, %s1289_s3   ;;  %v625_v10 = vmul.f32 %v1469_v29, %v1469_v29  ;;  %v631_v11 = vadd.f32 %v630_v6, %v624_v4  ;;  %v610_v12 = vadd.f32 %v609_v5, %v1469_v29  ;;  %v626_v13 = vmul.f32 %v1477_v37, %v1477_v37 }
  0xdb   : > { %s719_s1 = scalar_lea.hbm %s1692_s7, %s1361_s13  ;;  %v576_v14 = vrot.slane %v575_v9, 4  ;;  %v597_v15 = vadd.f32 %v596_v8, %v590_v7  ;;  %s1699_s2 = scalar_lea.vmem [#allocation7], %s1453_s16 }
  0xdc   : > { %s1550_s28 = sshll.u32 %s1699_s2, 4  ;;  %v611_v16 = vadd.f32 %v610_v12, %v1477_v37  ;;  %v632_v17 = vadd.f32 %v631_v11, %v625_v10  ;;  %s1553_s3 = sshll.u32 %s719_s1, 4 }
  0xdd   : > { %1715 = sst [smem:[#allocation16_spill]] %s1550_s28  ;;  %v577_v18 = vadd.f32 %v576_v14, %v575_v9  ;;  %v598_v19 = vrot.slane %v597_v15, 4  ;;  %s706_s23 = scalar_lea.hbm %s1691_s6, %s1361_s13 }
  0xde   : > { %1716 = sst [smem:[#allocation17_spill]] %s1553_s3  ;;  %v612_v20 = vrot.slane %v611_v16, 4  ;;  %v633_v21 = vadd.f32 %v632_v17, %v626_v13  ;;  %s363_s0 = scalar_lea.vmem [#allocation6], %s1453_s16 }
  0xdf   : > { %v578_v22 = vrot.slane %v577_v18, 2  ;;  %v599_v23 = vadd.f32 %v598_v19, %v597_v15  ;;  %s1562_s25 = sshll.u32 %s363_s0, 4  ;;  %s732_s21 = scalar_lea.hbm %s1693_s8, %s1361_s13  ;;  %s709_s25 = int_to_ptr.vmem [resolvable:$true] %s1562_s25 }
  0xe0   : > { %v613_v24 = vadd.f32 %v612_v20, %v611_v16  ;;  %v634_v25 = vrot.slane %v633_v21, 4  ;;  %s1568_s22 = sshll.u32 %s706_s23, 4  ;;  %s1696_s17 = scalar_lea.vmem [#allocation9], %s1453_s16  ;;  %s711_s22 = int_to_ptr.hbm [resolvable:$true] %s1568_s22 }
  0xe1   : > { %v579_v26 = vadd.f32 %v578_v22, %v577_v18  ;;  %v600_v27 = vrot.slane %v599_v23, 2  ;;  %s1573_s1 = sshll.u32 %s1696_s17, 4  ;;  %s745_s26 = scalar_lea.hbm %s1694_s9, %s1361_s13 }
  0xe2   : > { %v614_v28 = vrot.slane %v613_v24, 2  ;;  %v635_v29 = vadd.f32 %v634_v25, %v633_v21  ;;  %1717 = sst [smem:[#allocation18_spill]] %s1573_s1  ;;  %s1580_s29 = sshll.u32 %s732_s21, 4  ;;  %s737_s29 = int_to_ptr.hbm [resolvable:$true] %s1580_s29 }
  0xe3   : > { %v580_v30 = vrot.slane %v579_v26, 1  ;;  %v601_v31 = vadd.f32 %v600_v27, %v599_v23  ;;  %s381_s23 = scalar_lea.vmem [#allocation10], %s1453_s16  ;;  %s1589_s28 = sshll.u32 %s745_s26, 4  ;;  %s750_s28 = int_to_ptr.hbm [resolvable:$true] %s1589_s28 }
  0xe4   : > { %v615_v32 = vadd.f32 %v614_v28, %v613_v24  ;;  %v636_v33 = vrot.slane %v635_v29, 2  ;;  %s1587_s17 = sshll.u32 %s381_s23, 4  ;;  %s1142_s14 = sshra.s32 %s711_s22, 4  ;;  %s1143_s14 = int_to_ptr.hbm [resolvable:$true] %s1142_s14  ;;  %s748_s17 = int_to_ptr.vmem [resolvable:$true] %s1587_s17 }
  0xe5   : > { %v602_v34 = vrot.slane %v601_v31, 1  ;;  %v581_v35 = vadd.f32 %v580_v30, %v579_v26  ;;  %s1144_s21 = scalar_lea.hbm %s1143_s14, 1  ;;  %s1148_s2 = scalar_lea.hbm %s1691_s6, 2 }
  0xe6   : > { %v616_v36 = vrot.slane %v615_v32, 1  ;;  %v637_v37 = vadd.f32 %v636_v33, %v635_v29  ;;  %p1145_p13 = scmp.ne.s32.totalorder %s1143_s14, %s1144_s21  ;;  %p1149_p2 = scmp.lt.s32.totalorder %s1143_s14, %s1691_s6 }
  0xe7   : > { %v603_v38 = vadd.f32 %v602_v34, %v601_v31  ;;  %582 = vst [vmem:[%s363_s0] sm:$0x1] %v581_v35  ;;  %p1150_p3 = scmp.lt.s32.totalorder %s1148_s2, %s1144_s21 }
  0xe8   : > { %p1146_p0 = pnand %p1145_p13, %p1380_p5 }
  0xe9   : > { %p1151_p4 = por %p1150_p3, %p1149_p2 }
  0xea   : > { %p1147_p1 = pneg %p1146_p0 }
  0xec   : > { %p1152_p7 = pnand %p1151_p4, %p1147_p1 }
  0xee   : > { %1155 = shalt.err (!%p1152_p7)
}
  0xef   : > { %s1718_s0 = sld [smem:[#allocation17_spill]]  ;;  %v617_v39 = vadd.f32 %v616_v36, %v615_v32  ;;  %v638_v40 = vrot.slane %v637_v37, 1  ;;  %s1719_s1 = scalar_lea.vmem [#allocation7], %s1453_s16 }
  0xf0   : > { %1008 = dma.vmem_to_hbm [thread:$0]  (%p1380_p5), %s709_s25, 16, %s711_s22, %s1504_s27   ;;  %604 = vst [vmem:[%s1719_s1] sm:$0x1] %v603_v38 }
  0xf1   : > { %s1720_s4 = sand.u32 1, %s1361_s13   ;;  %s1176_s27 = scalar_lea.hbm %s1692_s7, 2 }
  0xf2   : > { %s1609_s2 = scalar_lea.sflag [#allocation8], %s1720_s4 }
  0xf5   : > { %s1721_s3 = int_to_ptr.hbm [resolvable:$true] %s1718_s0 }
  0xf6   : > { %s1170_s26 = sshra.s32 %s1721_s3, 4  ;;  %s1171_s26 = int_to_ptr.hbm [resolvable:$true] %s1170_s26 }
  0xf7   : > { %s1172_s14 = scalar_lea.hbm %s1171_s26, 1  ;;  %p1177_p11 = scmp.lt.s32.totalorder %s1171_s26, %s1692_s7 }
  0xf8   : > { %p1173_p8 = scmp.ne.s32.totalorder %s1171_s26, %s1172_s14  ;;  %p1178_p12 = scmp.lt.s32.totalorder %s1176_s27, %s1172_s14 }
  0xfa   : > { %p1174_p9 = pnand %p1173_p8, %p1380_p5  ;;  %p1179_p13 = por %p1178_p12, %p1177_p11 }
  0xfc   : > { %p1175_p10 = pneg %p1174_p9 }
  0xfe   : > { %p1180_p0 = pnand %p1179_p13, %p1175_p10 }
 0x100   : > { %1183 = shalt.err (!%p1180_p0)
}
 0x101   : > { %s1722_s13 = smov %s1721_s3  ;;  %s1723_s1 = sld [smem:[#allocation16_spill]]  ;;  %v639_v41 = vadd.f32 %v638_v40, %v637_v37 }
 0x102   : > { %s1725_s3 = scalar_lea.vmem [#allocation9], %s1453_s16  ;;  %s1198_s26 = sshra.s32 %s737_s29, 4  ;;  %s1199_s26 = int_to_ptr.hbm [resolvable:$true] %s1198_s26 }
 0x103   : > { %618 = vst [vmem:[%s1725_s3] sm:$0x1] %v617_v39  ;;  %s1200_s14 = scalar_lea.hbm %s1199_s26, 1  ;;  %s1204_s0 = scalar_lea.hbm %s1693_s8, 2 }
 0x104   : > { %p1201_p1 = scmp.ne.s32.totalorder %s1199_s26, %s1200_s14  ;;  %p1205_p4 = scmp.lt.s32.totalorder %s1199_s26, %s1693_s8 }
 0x105   : > { %p1206_p7 = scmp.lt.s32.totalorder %s1204_s0, %s1200_s14 }
 0x106   : > { %p1202_p2 = pnand %p1201_p1, %p1380_p5 }
 0x107   : > { %s1724_s4 = int_to_ptr.vmem [resolvable:$true] %s1723_s1  ;;  %p1207_p8 = por %p1206_p7, %p1205_p4 }
 0x108   : > { %1009 = dma.vmem_to_hbm [thread:$0]  (%p1380_p5), %s1724_s4, 16, %s1722_s13, %s1609_s2  }
 0x109   : > { %p1203_p3 = pneg %p1202_p2 }
 0x10b   : > { %p1208_p9 = pnand %p1207_p8, %p1203_p3 }
 0x10d   : > { %1211 = shalt.err (!%p1208_p9)
}
 0x10e   : > { %s1726_s22 = sld [smem:[#allocation18_spill]]  ;;  %640 = vst [vmem:[%s381_s23] sm:$0x1] %v639_v41  ;;  %s664_s1 = scalar_lea.sflag [#allocation11], %s1453_s16 }
 0x10f   : > { %s1226_s4 = sshra.s32 %s750_s28, 4  ;;  %s1232_s21 = scalar_lea.hbm %s1694_s9, 2  ;;  %s1227_s4 = int_to_ptr.hbm [resolvable:$true] %s1226_s4 }
 0x110   : > { %s1228_s3 = scalar_lea.hbm %s1227_s4, 1  ;;  %p1233_p13 = scmp.lt.s32.totalorder %s1227_s4, %s1694_s9 }
 0x111   : > { %p1229_p10 = scmp.ne.s32.totalorder %s1227_s4, %s1228_s3  ;;  %p1234_p0 = scmp.lt.s32.totalorder %s1232_s21, %s1228_s3 }
 0x113   : > { %p1230_p11 = pnand %p1229_p10, %p1380_p5  ;;  %p1235_p1 = por %p1234_p0, %p1233_p13 }
 0x114   : > { %s1727_s13 = int_to_ptr.vmem [resolvable:$true] %s1726_s22 }
 0x115   : > { %1010 = dma.vmem_to_hbm [thread:$0]  (%p1380_p5), %s1727_s13, 16, %s737_s29, %s1609_s2  }
 0x116   : > { %p1231_p12 = pneg %p1230_p11 }
 0x118   : > { %p1236_p2 = pnand %p1235_p1, %p1231_p12 }
 0x11a   : > { %1239 = shalt.err (!%p1236_p2)
}
 0x11b   : > { %1011 = dma.vmem_to_hbm [thread:$0]  (%p1380_p5), %s748_s17, 16, %s750_s28, %s664_s1  }
 0x11c PF: > { %p1037_p3 = scmp.ge.s32.totalorder %s1286_s12, 2  ;;  %s761_s16 = sand.u32 1, %s1274_s30  }
 0x11d   : > { %s762_s29 = scalar_lea.sflag [#allocation3], %s761_s16 }
 0x11e   : > { %p1019_p4 = pnand %p1037_p3, %p1384_p6 }
 0x120   : > { %p1020_p7 = pneg %p1019_p4 }
 0x122   : > { %1257 = dma.done.wait (%p1020_p7), %s762_s29, 1024  }
 0x123   : > { %1259 = vsyncadd (%p1020_p7), %s762_s29, 4294966272  ;;  %s1728_s23 = sadd.s32 4294967294, %s1286_s12  }
 0x124   : > { %s771_s19 = sand.u32 1, %s1728_s23  }
 0x125   : > { %s772_s2 = scalar_lea.sflag [#allocation5], %s771_s19 }
 0x126   : > { %1261 = dma.done.wait (%p1020_p7), %s772_s2, 1040  }
 0x127   : > { %1263 = vsyncadd (%p1020_p7), %s772_s2, 4294966256  ;;  %s791_s27 = scalar_lea.sflag [#allocation8], %s771_s19 }
 0x128   : > { %1265 = dma.done.wait (%p1020_p7), %s791_s27, 32  }
 0x129   : > { %1267 = vsyncadd (%p1020_p7), %s791_s27, 4294967264  ;;  %s809_s28 = scalar_lea.sflag [#allocation11], %s761_s16 }
 0x12a   : > { %1269 = dma.done.wait (%p1020_p7), %s809_s28, 16  }
 0x12b   : > { %1271 = vsyncadd (%p1020_p7), %s809_s28, 4294967280  ;;  %p29_p5 = scmp.ge.s32.totalorder %s1365_s15, 4   ;;  %s1729_s30 = smov %s1278_s10 }
 0x12c   : > { %s1730_s10 = smov %s1282_s11  ;;  %s1731_s11 = smov %s1378_s18 }
 0x12d   : > { %s1732_s12 = smov %s1365_s15  ;;  %31 = sbr.rel (!%p29_p5) target bundleno = 15 (0xf), region = 155 }
 0x132   :  { %814 = vsyncpa [#allocation3], 1 }
 0x133   :  { %816 = vsyncpa [#allocation3 + $0x1], 1 }
 0x134   :  { %817 = vsyncpa [#allocation5], 1 }
 0x135   :  { %819 = vsyncpa [#allocation5 + $0x1], 1 }
 0x136   :  { %820 = vsyncpa [#allocation8], 1 }
 0x137   :  { %822 = vsyncpa [#allocation8 + $0x1], 1 }
 0x138   :  { %823 = vsyncpa [#allocation11], 1 }
 0x139   :  { %825 = vsyncpa [#allocation11 + $0x1], 1 }

</bundles_post_ra>
